<compile_context>
chip_gen: v7x
topology: tpu7x:2x2x1
jax: 0.10.0
libtpu: 0.0.40
codegen_flags: <defaults>
</compile_context>

<pallas_src>
import functools

import jax
import jax.numpy as jnp
from jax.experimental import pallas as pl
from jax.experimental.pallas import tpu as pltpu


def _round_up(x, m):
    return (x + m - 1) // m * m


def _binary_conv_matmul_kernel(w_ref, p_ref, o_ref):
    """w_ref: (O_p, kdim_p) bf16 sign(weights); p_ref: (kdim_p, tm) bf16 im2col
    patches (transposed: rows on lanes); o_ref: (O_p, tm) — one MXU matmul with
    f32 accumulation per row tile."""
    o_ref[...] = jnp.dot(
        w_ref[...], p_ref[...], preferred_element_type=jnp.float32
    ).astype(o_ref.dtype)


@functools.partial(jax.jit, static_argnames=("row_tile",))
def binary_conv2d(x_nchw, weight_oikk, *, row_tile=2048):
    """Forward of BinaryConv2dLayer: conv2d(x, sign(weight)), stride 1, no pad."""
    N, C, H, W = x_nchw.shape
    O, Ci, K, Kw = weight_oikk.shape
    assert Ci == C and Kw == K
    Hout, Wout = H - K + 1, W - K + 1
    out_dtype = x_nchw.dtype

    rows = N * Hout * Wout
    kdim = K * K * C

    # ---- Padded dims ---------------------------------------------------------
    # Contraction dim: bf16 sublane multiple only (36 -> 48), NOT 128.
    kdim_p = _round_up(kdim, 16)
    # Output channels: sublane multiple of the stored dtype only (8 f32 / 16 bf16).
    store_bf16 = out_dtype == jnp.bfloat16
    acc_store_dtype = jnp.bfloat16 if store_bf16 else jnp.float32
    out_itemsize = 2 if store_bf16 else 4
    o_p = _round_up(O, 16 if store_bf16 else 8)

    # Rows are the lane axis of both patches_T and the output: multiple of 128
    # keeps every vld/vst unmasked.
    rows_lanes = _round_up(rows, 128)
    tm = max(128, min(_round_up(row_tile, 128), rows_lanes))
    # v7x megacore: if everything fits in one tile but there is enough work to
    # split, halve the tile so the "parallel" grid has >= 2 steps (both TCs).
    if tm >= rows_lanes and rows_lanes >= 256:
        tm = _round_up(rows_lanes // 2, 128)
    rows_p = _round_up(rows, tm)
    grid = (rows_p // tm,)
    # VMEM: per-step blocks ~ tm * (2*kdim_p + o_p*itemsize) bytes (~tm*128 B),
    # so double-buffering stays far below the v5e 16 MiB scoped default and the
    # v6e/v7x 32 MiB default — no vmem_limit_bytes override needed.

    # ---- Wrapper-side preprocessing (XLA, done once) -------------------------
    # NCHW -> NHWC so channels are minor; build im2col directly in transposed
    # (kdim, rows) orientation: axis 0 ordered (kh, kw, c), axis 1 = (n, ho, wo).
    x_nhwc = jnp.transpose(x_nchw, (0, 2, 3, 1))                   # (N, H, W, C)
    patches = jnp.stack(
        [x_nhwc[:, kh:kh + Hout, kw:kw + Wout, :]
         for kh in range(K) for kw in range(K)],
        axis=0,
    )                                                              # (K*K, N, Hout, Wout, C)
    patches_t = jnp.transpose(patches, (0, 4, 1, 2, 3)).reshape(kdim, rows)
    patches_t = jnp.pad(patches_t.astype(jnp.bfloat16),
                        ((0, kdim_p - kdim), (0, rows_p - rows)))

    # Binarize weights once (jnp.sign(0) == 0 matches torch.sign) and lay them
    # out as (O, K*K*C) with the same (kh, kw, c) ordering as the patches.
    w_sign = jnp.sign(weight_oikk)                                 # (O, C, K, K)
    w_mat = jnp.transpose(w_sign, (0, 2, 3, 1)).reshape(O, kdim)   # (O, kdim)
    w_mat = jnp.pad(w_mat.astype(jnp.bfloat16),
                    ((0, o_p - O), (0, kdim_p - kdim)))

    cost = pl.CostEstimate(
        flops=2 * rows * kdim * O,
        transcendentals=0,
        bytes_accessed=(
            rows_p * kdim_p * 2                       # patch-tile reads (bf16)
            + grid[0] * o_p * kdim_p * 2              # (tiny) weight per step
            + rows_p * o_p * out_itemsize             # output writeback
        ),
    )

    out_p = pl.pallas_call(
        _binary_conv_matmul_kernel,
        out_shape=jax.ShapeDtypeStruct((o_p, rows_p), acc_store_dtype),
        grid=grid,
        in_specs=[
            pl.BlockSpec((o_p, kdim_p), lambda i: (0, 0)),     # full (tiny) weights
            pl.BlockSpec((kdim_p, tm), lambda i: (0, i)),      # row tile of patches^T
        ],
        out_specs=pl.BlockSpec((o_p, tm), lambda i: (0, i)),
        compiler_params=pltpu.CompilerParams(
            dimension_semantics=("parallel",),                 # megacore on v7x
        ),
        cost_estimate=cost,
    )(w_mat, patches_t)

    # Slice away the padding, reshape, and return NCHW to match PyTorch.
    out = out_p[:O, :rows].reshape(O, N, Hout, Wout).astype(out_dtype)
    return jnp.transpose(out, (1, 0, 2, 3))


if __name__ == "__main__":
    key = jax.random.PRNGKey(0)
    kx, kw = jax.random.split(key)

    # Module config: out_channel=8, in_channel=4, filter_size=3
    N, C, H, W = 2, 4, 16, 16
    O, K = 8, 3

    x = jax.random.normal(kx, (N, C, H, W), dtype=jnp.float32)
    # __init__: torch.nn.init.normal_(weight, mean=0, std=1) on (O, C, K, K)
    weight = jax.random.normal(kw, (O, C, K, K), dtype=jnp.float32)

    out = binary_conv2d(x, weight)
    out = jax.block_until_ready(out)

    # Reference: XLA conv with sign-binarized weights.  Activations are rounded
    # to bf16 exactly as the MXU operands are (±1/0 weights are exact in bf16),
    # so the check isolates kernel logic from the intentional bf16 operand cast.
    # (This is a documented deviation from PyTorch's pure-f32 conv.)
    x_ref = x.astype(jnp.bfloat16).astype(jnp.float32)
    ref = jax.lax.conv_general_dilated(
        x_ref, jnp.sign(weight),
        window_strides=(1, 1), padding="VALID",
        dimension_numbers=("NCHW", "OIHW", "NCHW"),
    )
    assert out.shape == (N, O, H - K + 1, W - K + 1)
    assert jnp.allclose(out, ref, atol=1e-3, rtol=1e-3), "mismatch vs reference conv"

    print("KERNEL_OK")
</pallas_src>

<mosaic_0001>
module attributes {stable_mosaic.version = 11 : i64} {
  func.func @_binary_conv_matmul_kernel(%arg0: i32, %arg1: memref<8x48xbf16, #tpu.memory_space<vmem>>, %arg2: memref<48x256xbf16, #tpu.memory_space<vmem>>, %arg3: memref<8x256xf32, #tpu.memory_space<vmem>>) attributes {dimension_semantics = [#tpu.dimension_semantics<parallel>], iteration_bounds = array<i64: 2>, scalar_prefetch = 0 : i64, scratch_operands = 0 : i64, tpu.core_type = #tpu.core_type<tc>, window_params = [{pipeline_mode = #tpu.pipeline_mode<synchronous>, transform_indices = @transform_0, window_bounds = array<i64: 8, 48>}, {transform_indices = @transform_1, window_bounds = array<i64: 48, 256>}, {transform_indices = @transform_2, window_bounds = array<i64: 8, 256>}]} {
    %c0 = arith.constant 0 : index
    %c0_0 = arith.constant 0 : index
    %0 = vector.load %arg1[%c0, %c0_0] : memref<8x48xbf16, #tpu.memory_space<vmem>>, vector<8x48xbf16>
    %c0_1 = arith.constant 0 : index
    %c0_2 = arith.constant 0 : index
    %1 = vector.load %arg2[%c0_1, %c0_2] : memref<48x256xbf16, #tpu.memory_space<vmem>>, vector<48x256xbf16>
    %cst = arith.constant dense<0.000000e+00> : vector<8x256xf32>
    %2 = tpu.matmul %0, %1, %cst {dimension_numbers = #tpu.dot_dimension_numbers<[1], [0], [0], [1], [0, 0, 1, 1], [], []>} : vector<8x48xbf16>, vector<48x256xbf16>, vector<8x256xf32> -> vector<8x256xf32>
    %c0_3 = arith.constant 0 : index
    %c0_4 = arith.constant 0 : index
    %3 = vector.load %arg3[%c0_3, %c0_4] : memref<8x256xf32, #tpu.memory_space<vmem>>, vector<8x256xf32>
    tpu.vector_store %arg3[%c0_3, %c0_4], %2 {strides = array<i32>} : memref<8x256xf32, #tpu.memory_space<vmem>>, vector<8x256xf32>,
    return
  }
  func.func @transform_0(%arg0: i32) -> (i32, i32) {
    %c0_i32 = arith.constant 0 : i32
    %c0_i32_0 = arith.constant 0 : i32
    %c0_i32_1 = arith.constant 0 : i32
    return %c0_i32, %c0_i32_0 : i32, i32
  }
  func.func @transform_1(%arg0: i32) -> (i32, i32) {
    %c0_i32 = arith.constant 0 : i32
    %c0_i32_0 = arith.constant 0 : i32
    return %c0_i32, %arg0 : i32, i32
  }
  func.func @transform_2(%arg0: i32) -> (i32, i32) {
    %c0_i32 = arith.constant 0 : i32
    %c0_i32_0 = arith.constant 0 : i32
    return %c0_i32, %arg0 : i32, i32
  }
}

</mosaic_0001>

<bundles_post_ra>
// kernel: binary_conv2d.1
= control target key start
LH: loop header
LB: loop body
LE: loop exit
PB: predicated region body
PF: predicated region fallthrough
CT: control target
= control target key end

     0   :  { %s443_s9 = smov 0   ;;  %s445_s10 = smov 0   ;;  %s498_s0 = inlined_call_operand.vmem [shape: bf16[8,48], index: 0, kind: input, shape index: {}]   ;;  %s499_s1 = inlined_call_operand.vmem [shape: bf16[48,512], index: 1, kind: input, shape index: {}]   ;;  %s500_s2 = inlined_call_operand.vmem [shape: f32[8,512], index: 2, kind: output, shape index: {}]  }
   0x1   :  { %s447_s11 = smov 0  }
   0x2 LB: > { %s348_s12 = sadd.s32 4294967295, %s425_s11   ;;  %s460_s13 = sadd.s32 1, %s425_s11   ;;  %s425_s11 = sphi %s447_s11, %s503_s11   ;;  %s421_s10 = sphi %s445_s10, %s502_s10   ;;  %s417_s9 = sphi %s443_s9, %s501_s9  }
   0x3   : > { %s37_s14 = ssub.s32 %s425_s11, %s460_s13  ;;  %s40_s15 = sadd.s32 1, %s421_s10 }
   0x4   : > { %p38_p0 = scmp.eq.s32.totalorder %s37_s14, 0  ;;  %p47_p1 = scmp.ne.s32.totalorder %s421_s10, %s417_s9 }
   0x5   : > { %p48_p2 = scmp.eq.s32.totalorder %s425_s11, 0  ;;  %p351_p4 = scmp.ge.s32.totalorder %s425_s11, 2 }
   0x6   : > { %s469_s16 = scalar_select %p38_p0, %s421_s10, %s40_s15  }
   0x7   : > { %p49_p3 = por %p48_p2, %p47_p1  ;;  %102 = sbr.rel (%p351_p4) target bundleno = 21 (0x15), region = 20 }
   0xe   : > { %105 = sbr.rel (!%p49_p3) target bundleno = 21 (0x15), region = 24  ;;  %s107_s17 = sand.u32 (%p49_p3), 1, %s421_s10  }
   0xf   : > { %s366_s18 = sshll.u32 (%p49_p3), %s425_s11, 3  ;;  %s367_s19 = smul.u32 (%p49_p3), 48, %s107_s17 }
  0x10   : > { %s112_s22 = scalar_lea.vmem (%p49_p3), %s499_s1, %s366_s18 }
  0x11   : > { %v150_v0 = vld [vmem:[%s112_s22] sm:$0xff] (%p49_p3)  ;;  %v152_v1 = vld [vmem:[%s112_s22 + $0x10] sm:$0xff] (%p49_p3)  ;;  %s109_s23 = scalar_lea.vmem (%p49_p3), [#allocation2], %s367_s19 }
  0x12   : > { %v154_v2 = vld [vmem:[%s112_s22 + $0x20] sm:$0xff] (%p49_p3)  ;;  %v156_v3 = vld [vmem:[%s112_s22 + $0x30] sm:$0xff] (%p49_p3)  ;;  %151 = vst [vmem:[%s109_s23] sm:$0xff] (%p49_p3), %v150_v0  ;;  %153 = vst [vmem:[%s109_s23 + $0x8] sm:$0xff] (%p49_p3), %v152_v1 }
  0x13   : > { %v158_v4 = vld [vmem:[%s112_s22 + $0x40] sm:$0xff] (%p49_p3)  ;;  %v160_v5 = vld [vmem:[%s112_s22 + $0x50] sm:$0xff] (%p49_p3)  ;;  %155 = vst [vmem:[%s109_s23 + $0x10] sm:$0xff] (%p49_p3), %v154_v2  ;;  %157 = vst [vmem:[%s109_s23 + $0x18] sm:$0xff] (%p49_p3), %v156_v3 }
  0x14   : > { %159 = vst [vmem:[%s109_s23 + $0x20] sm:$0xff] (%p49_p3), %v158_v4  ;;  %161 = vst [vmem:[%s109_s23 + $0x28] sm:$0xff] (%p49_p3), %v160_v5 }
  0x15 PF: > { %p354_p5 = scmp.ge.s32.totalorder %s425_s11, 1  ;;  %p166_p6 = scmp.lt.s32.totalorder %s425_s11, 3 }
  0x17   : > { %p167_p7 = pnand %p354_p5, %p166_p6 }
  0x18   : > { %s173_s24 = sand.u32 (!%p167_p7), 1, %s417_s9   ;;  %v427_v6 = vmov (!%p167_p7), 0   ;;  %v202_v13 = vld [vmem:[%s498_s0] sm:$0xf] (!%p167_p7)  ;;  %vm239_vm0 = vcmask (!%p167_p7), 392192   ;;  %s355_s29 = sshll.u32 (!%p167_p7), %s348_s12, 1 }
  0x19   : > { %170 = sbr.rel (%p167_p7) target bundleno = 257 (0x101), region = 62  ;;  %275 = vmatprep.mubr.bf16.mxu0 (!%p167_p7), %v427_v6  ;;  %p196_p8 = scmp.lt.s32.totalorder (!%p167_p7), %s355_s29, 3 }
  0x1a   : > { %s368_s25 = smul.u32 (!%p167_p7), 48, %s173_s24 }
  0x1c   : > { %s175_s26 = scalar_lea.vmem (!%p167_p7), [#allocation2], %s368_s25 }
  0x1d   : > { %v394_v7 = vld [vmem:[%s175_s26 + $0x4] ss:$8 sps:$4 sm:$0xff] (!%p167_p7)   ;;  %v396_v8 = vld [vmem:[%s175_s26] ss:$8 sps:$4 sm:$0xff] (!%p167_p7)   ;;  %v397_v9 = vld [vmem:[%s175_s26 + $0x14] ss:$8 sps:$4 sm:$0xff] (!%p167_p7)  }
  0x1e   : > { %243 = vmatprep.subr.bf16.mxu0 (!%p167_p7), %v394_v7  ;;  %v399_v10 = vld [vmem:[%s175_s26 + $0x10] ss:$8 sps:$4 sm:$0xff] (!%p167_p7)   ;;  %v400_v11 = vld [vmem:[%s175_s26 + $0x24] ss:$8 sps:$4 sm:$0xff] (!%p167_p7)   ;;  %v402_v12 = vld [vmem:[%s175_s26 + $0x20] ss:$8 sps:$4 sm:$0xff] (!%p167_p7)  }
  0x1f   : > { %244 = vmatpush1.bf16.msra.mxu0 (!%p167_p7), %v396_v8 }
  0x20   : > { %245 = vmatprep.subr.bf16.mxu0 %v397_v9  ;;  %s505_s29 = smov (!%p196_p8, %s355_s29), 3 }
  0x21   : > { %s356_s30 = sshll.u32 %s505_s29, 3 }
  0x22   : > { %s199_s5 = scalar_lea.vmem %s500_s2, %s356_s30 }
  0x23   : > { %246 = vmatpush1.bf16.msra.mxu0 %v399_v10 }
  0x24   : > { %247 = vmatprep.subr.bf16.mxu0 %v400_v11 }
  0x27   : > { %248 = vmatpush1.bf16.msra.mxu0 %v402_v12 }
  0x2a   : > { %363 = vmatmul.mubr.msk.bf16.vlgmr.msra.gmra.mrb[0].mxu0 %vm239_vm0, %v202_v13 }
  0xfd   : > { %v277_v14 = vpop.f32.mrb[0].mxu0 }
  0xfe   : > { %284 = vst [vmem:[%s199_s5] sm:$0xff] %v277_v14  ;;  %v279_v15 = vpop.f32.mrb[1].mxu0 }
  0xff   : > { %285 = vst [vmem:[%s199_s5 + $0x8] sm:$0xff] %v279_v15  ;;  %v281_v16 = vpop.f32.mrb[2].mxu0 }
 0x100   : > { %v282_v17 = vpop.f32.mrb[3].mxu0 }
 0x101 PF: > { %p9_p9 = scmp.ge.s32.totalorder %s460_s13, 4   ;;  %s501_s9 = smov %s421_s10 }
 0x102   : > { %s502_s10 = smov %s469_s16  ;;  %s503_s11 = smov %s460_s13 }
 0x103   :  { %11 = sbr.rel (!%p9_p9) target bundleno = 2 (0x2), region = 101 }

</bundles_post_ra>
